<compile_context>
chip_gen: v5e
topology: v5e:2x2
jax: 0.10.0
libtpu: 0.0.40
codegen_flags: <defaults>
</compile_context>

<pallas_src>
import functools

import jax
import jax.numpy as jnp
from jax.experimental import pallas as pl
from jax.experimental.pallas import tpu as pltpu


LN_EPS = 1e-5


def _round_up(a, b):
    return (a + b - 1) // b * b


def _vmem_capacity_bytes():
    """Per-core VMEM capacity; conservative (v7x per-TC) fallback if unavailable."""
    try:
        return int(pltpu.get_tpu_info().vmem_capacity_bytes)
    except Exception:
        return 64 << 20


def ffn_layernorm_kernel(x_ref, w1_ref, w2_ref, gamma_ref, beta_ref, o_ref,
                         *, compute_dtype):
    # x_ref:     (TM, d_model)    current token tile
    # w1_ref:    (d_model, d_ff)  resident weight (already compute_dtype)
    # w2_ref:    (d_ff, d_model)  resident weight (already compute_dtype)
    # gamma_ref: (1, d_model)
    # beta_ref:  (1, d_model)
    x = x_ref[...]

    # fc: Linear -> ReLU -> Linear (both bias=False); MXU matmuls.
    # First dot materializes in compute_dtype (bf16 halves the hidden buffer and
    # skips a full-tile f32->bf16 cast); MXU accumulation is f32 internally.
    h = jnp.dot(x.astype(compute_dtype), w1_ref[...],
                preferred_element_type=compute_dtype)
    h = jnp.maximum(h, 0.0)
    # Second dot accumulates into f32 for the residual + LayerNorm path.
    y = jnp.dot(h, w2_ref[...], preferred_element_type=jnp.float32)

    # Residual add in f32 (residual is never rounded to bf16).
    y = y + x.astype(jnp.float32)

    # LayerNorm over last dim (biased variance, like torch.nn.LayerNorm).
    mean = jnp.mean(y, axis=-1, keepdims=True)
    centered = y - mean
    var = jnp.mean(centered * centered, axis=-1, keepdims=True)
    # Fold gamma into the per-row rsqrt scale (rsqrt runs on the EUP slot).
    scale = gamma_ref[...].astype(jnp.float32) * jax.lax.rsqrt(var + LN_EPS)
    o_ref[...] = (centered * scale
                  + beta_ref[...].astype(jnp.float32)).astype(o_ref.dtype)


def _choose_tm(n, d_model, d_ff, w_itemsize, h_itemsize, x_itemsize, budget_bytes):
    """Largest 128-aligned token tile that fits the VMEM budget (floor 128)."""
    # Pallas double-buffers every blocked input, including the "resident" weights
    # (a constant index_map does not suppress the second buffer), so count them 2x.
    resident = 2 * (2 * d_model * d_ff * w_itemsize + 2 * d_model * 4)
    headroom = 4 << 20                                  # compiler scratch headroom
    cap = max(128, _round_up(n, 128))                   # no point exceeding padded N
    for tm in (1024, 512, 256, 128):
        if tm > cap:
            continue
        io_bufs = 2 * tm * d_model * 2 * x_itemsize     # double-buffered x + out tiles
        interm = tm * d_ff * h_itemsize + 3 * tm * d_model * 4   # hidden + f32 temps
        if resident + io_bufs + interm + headroom <= budget_bytes:
            return tm
    # TODO(synk): if even TM=128 doesn't fit (non-ViT sizes), stream d_ff as an inner
    # "arbitrary" grid axis instead of shrinking the MXU M dimension further.
    return 128


def poswise_feed_forward(x, w1, w2, gamma, beta, *, tm=None,
                         matmul_dtype=jnp.bfloat16,
                         vmem_limit_bytes=None):
    """x: (batch, seq, d_model). w1: (d_model, d_ff), w2: (d_ff, d_model).
    gamma/beta: (d_model,). Returns (batch, seq, d_model) in x.dtype."""
    batch, seq, d_model = x.shape
    d_ff = w1.shape[1]
    n = batch * seq

    # Cast weights wrapper-side (halves HBM traffic + VMEM residency for bf16).
    w1 = w1.astype(matmul_dtype)
    w2 = w2.astype(matmul_dtype)
    w_itemsize = jnp.dtype(matmul_dtype).itemsize
    x_itemsize = jnp.dtype(x.dtype).itemsize

    if vmem_limit_bytes is None:
        cap = _vmem_capacity_bytes()
        # ~100 MiB on 128 MiB parts (v5e/v6e), ~48 MiB on 64 MiB/TC parts (v7x).
        vmem_limit_bytes = min(cap - (16 << 20), 100 << 20)

    if tm is None:
        tm = _choose_tm(n, d_model, d_ff, w_itemsize, w_itemsize, x_itemsize,
                        vmem_limit_bytes)
    tm = max(8, _round_up(tm, 8))

    n_pad = _round_up(n, tm)
    x2d = x.reshape(n, d_model)
    if n_pad != n:
        # Zero padding: padded rows produce beta after LayerNorm and are sliced off.
        x2d = jnp.pad(x2d, ((0, n_pad - n), (0, 0)))
    gamma2d = gamma.reshape(1, d_model)
    beta2d = beta.reshape(1, d_model)

    grid = (pl.cdiv(n_pad, tm),)

    cost = pl.CostEstimate(
        flops=4 * n_pad * d_model * d_ff,  # two (n_pad,d_model)x(d_model,d_ff) matmuls
        bytes_accessed=(2 * n_pad * d_model * x_itemsize
                        + 2 * d_model * d_ff * w_itemsize
                        + 2 * d_model * 4),
        transcendentals=n_pad,             # one rsqrt per token row
    )

    kernel = functools.partial(ffn_layernorm_kernel, compute_dtype=matmul_dtype)

    out2d = pl.pallas_call(
        kernel,
        out_shape=jax.ShapeDtypeStruct((n_pad, d_model), x.dtype),
        grid_spec=pltpu.PrefetchScalarGridSpec(
            num_scalar_prefetch=0,
            grid=grid,
            in_specs=[
                pl.BlockSpec((tm, d_model), lambda i: (i, 0)),       # x: tiled
                pl.BlockSpec((d_model, d_ff), lambda i: (0, 0)),     # w1: resident
                pl.BlockSpec((d_ff, d_model), lambda i: (0, 0)),     # w2: resident
                pl.BlockSpec((1, d_model), lambda i: (0, 0)),        # gamma
                pl.BlockSpec((1, d_model), lambda i: (0, 0)),        # beta
            ],
            out_specs=pl.BlockSpec((tm, d_model), lambda i: (i, 0)),
        ),
        compiler_params=pltpu.CompilerParams(
            dimension_semantics=("parallel",),
            vmem_limit_bytes=int(vmem_limit_bytes),
        ),
        cost_estimate=cost,
    )(x2d, w1, w2, gamma2d, beta2d)

    return out2d[:n].reshape(batch, seq, d_model)


def _reference(x, w1, w2, gamma, beta):
    h = jnp.maximum(jnp.einsum("bsd,df->bsf", x, w1), 0.0)
    y = jnp.einsum("bsf,fd->bsd", h, w2) + x
    mean = jnp.mean(y, axis=-1, keepdims=True)
    var = jnp.mean((y - mean) ** 2, axis=-1, keepdims=True)
    return (y - mean) * jax.lax.rsqrt(var + LN_EPS) * gamma + beta


if __name__ == "__main__":
    def run_case(batch, seq, d_model, d_ff, tm=None,
                 matmul_dtype=jnp.bfloat16, atol=2e-2, rtol=2e-2):
        key = jax.random.PRNGKey(0)
        kx, kw1, kw2 = jax.random.split(key, 3)
        x = jax.random.normal(kx, (batch, seq, d_model), dtype=jnp.float32)
        # nn.Linear weights (torch stores (out,in)); kept here as (in,out).
        w1 = jax.random.normal(kw1, (d_model, d_ff), dtype=jnp.float32) * 0.05
        w2 = jax.random.normal(kw2, (d_ff, d_model), dtype=jnp.float32) * 0.05
        # nn.LayerNorm default init: weight=1, bias=0
        gamma = jnp.ones((d_model,), dtype=jnp.float32)
        beta = jnp.zeros((d_model,), dtype=jnp.float32)

        out = poswise_feed_forward(x, w1, w2, gamma, beta, tm=tm,
                                   matmul_dtype=matmul_dtype)
        out = jax.block_until_ready(out)

        ref = _reference(x, w1, w2, gamma, beta)
        assert out.shape == (batch, seq, d_model)
        assert jnp.allclose(out, ref, atol=atol, rtol=rtol), "mismatch vs reference"

    # f32 matmul path: bit-tight check (single grid step, auto TM=128).
    run_case(2, 8, 32, 64, matmul_dtype=jnp.float32, atol=1e-5, rtol=1e-5)
    # Default bf16 MXU path: tolerance appropriate for bf16 matmul inputs.
    run_case(2, 8, 32, 64)
    # Ragged-N config with a small forced tile: exercises padding + multi-step grid.
    run_case(2, 13, 32, 64, tm=8, matmul_dtype=jnp.float32, atol=1e-5, rtol=1e-5)

    print("KERNEL_OK")
</pallas_src>

<mosaic_0001>
module attributes {stable_mosaic.version = 11 : i64} {
  func.func @ffn_layernorm_kernel(%arg0: i32, %arg1: memref<128x32xf32, #tpu.memory_space<vmem>>, %arg2: memref<32x64xf32, #tpu.memory_space<vmem>>, %arg3: memref<64x32xf32, #tpu.memory_space<vmem>>, %arg4: memref<1x32xf32, #tpu.memory_space<vmem>>, %arg5: memref<1x32xf32, #tpu.memory_space<vmem>>, %arg6: memref<128x32xf32, #tpu.memory_space<vmem>>) attributes {dimension_semantics = [#tpu.dimension_semantics<parallel>], iteration_bounds = array<i64: 1>, scalar_prefetch = 0 : i64, scratch_operands = 0 : i64, tpu.core_type = #tpu.core_type<tc>, window_params = [{transform_indices = @transform_0, window_bounds = array<i64: 128, 32>}, {pipeline_mode = #tpu.pipeline_mode<synchronous>, transform_indices = @transform_1, window_bounds = array<i64: 32, 64>}, {pipeline_mode = #tpu.pipeline_mode<synchronous>, transform_indices = @transform_2, window_bounds = array<i64: 64, 32>}, {pipeline_mode = #tpu.pipeline_mode<synchronous>, transform_indices = @transform_3, window_bounds = array<i64: 1, 32>}, {pipeline_mode = #tpu.pipeline_mode<synchronous>, transform_indices = @transform_4, window_bounds = array<i64: 1, 32>}, {transform_indices = @transform_5, window_bounds = array<i64: 128, 32>}]} {
    %c0 = arith.constant 0 : index
    %c0_0 = arith.constant 0 : index
    %0 = vector.load %arg1[%c0, %c0_0] : memref<128x32xf32, #tpu.memory_space<vmem>>, vector<128x32xf32>
    %c0_1 = arith.constant 0 : index
    %c0_2 = arith.constant 0 : index
    %1 = vector.load %arg2[%c0_1, %c0_2] : memref<32x64xf32, #tpu.memory_space<vmem>>, vector<32x64xf32>
    %cst = arith.constant dense<0.000000e+00> : vector<128x64xf32>
    %2 = tpu.matmul %0, %1, %cst {dimension_numbers = #tpu.dot_dimension_numbers<[1], [0], [0], [1], [0, 0, 1, 1], [], []>} : vector<128x32xf32>, vector<32x64xf32>, vector<128x64xf32> -> vector<128x64xf32>
    %cst_3 = arith.constant 0.000000e+00 : f32
    %3 = vector.broadcast %cst_3 : f32 to vector<128x64xf32>
    %4 = arith.maximumf %2, %3 : vector<128x64xf32>
    %c0_4 = arith.constant 0 : index
    %c0_5 = arith.constant 0 : index
    %5 = vector.load %arg3[%c0_4, %c0_5] : memref<64x32xf32, #tpu.memory_space<vmem>>, vector<64x32xf32>
    %cst_6 = arith.constant dense<0.000000e+00> : vector<128x32xf32>
    %6 = tpu.matmul %4, %5, %cst_6 {dimension_numbers = #tpu.dot_dimension_numbers<[1], [0], [0], [1], [0, 0, 1, 1], [], []>} : vector<128x64xf32>, vector<64x32xf32>, vector<128x32xf32> -> vector<128x32xf32>
    %7 = arith.addf %6, %0 : vector<128x32xf32>
    %cst_7 = arith.constant dense<0.000000e+00> : vector<128xf32>
    %8 = vector.multi_reduction <add>, %7, %cst_7 [1] : vector<128x32xf32> to vector<128xf32>
    %9 = vector.shape_cast %8 : vector<128xf32> to vector<128x1xf32>
    %cst_8 = arith.constant 3.200000e+01 : f32
    %10 = vector.broadcast %cst_8 : f32 to vector<128x1xf32>
    %11 = arith.divf %9, %10 : vector<128x1xf32>
    %12 = vector.broadcast %11 : vector<128x1xf32> to vector<128x32xf32>
    %13 = arith.subf %7, %12 : vector<128x32xf32>
    %14 = arith.mulf %13, %13 : vector<128x32xf32>
    %cst_9 = arith.constant dense<0.000000e+00> : vector<128xf32>
    %15 = vector.multi_reduction <add>, %14, %cst_9 [1] : vector<128x32xf32> to vector<128xf32>
    %16 = vector.shape_cast %15 : vector<128xf32> to vector<128x1xf32>
    %cst_10 = arith.constant 3.200000e+01 : f32
    %17 = vector.broadcast %cst_10 : f32 to vector<128x1xf32>
    %18 = arith.divf %16, %17 : vector<128x1xf32>
    %c0_11 = arith.constant 0 : index
    %c0_12 = arith.constant 0 : index
    %19 = vector.load %arg4[%c0_11, %c0_12] : memref<1x32xf32, #tpu.memory_space<vmem>>, vector<1x32xf32>
    %cst_13 = arith.constant 9.99999974E-6 : f32
    %20 = vector.broadcast %cst_13 : f32 to vector<128x1xf32>
    %21 = arith.addf %18, %20 : vector<128x1xf32>
    %22 = math.rsqrt %21 : vector<128x1xf32>
    %23 = vector.broadcast %19 : vector<1x32xf32> to vector<128x32xf32>
    %24 = vector.broadcast %22 : vector<128x1xf32> to vector<128x32xf32>
    %25 = arith.mulf %23, %24 : vector<128x32xf32>
    %26 = arith.mulf %13, %25 : vector<128x32xf32>
    %c0_14 = arith.constant 0 : index
    %c0_15 = arith.constant 0 : index
    %27 = vector.load %arg5[%c0_14, %c0_15] : memref<1x32xf32, #tpu.memory_space<vmem>>, vector<1x32xf32>
    %28 = vector.broadcast %27 : vector<1x32xf32> to vector<128x32xf32>
    %29 = arith.addf %26, %28 : vector<128x32xf32>
    %c0_16 = arith.constant 0 : index
    %c0_17 = arith.constant 0 : index
    %30 = vector.load %arg6[%c0_16, %c0_17] : memref<128x32xf32, #tpu.memory_space<vmem>>, vector<128x32xf32>
    tpu.vector_store %arg6[%c0_16, %c0_17], %29 {strides = array<i32>} : memref<128x32xf32, #tpu.memory_space<vmem>>, vector<128x32xf32>,
    return
  }
  func.func @transform_0(%arg0: i32) -> (i32, i32) {
    %c0_i32 = arith.constant 0 : i32
    %c0_i32_0 = arith.constant 0 : i32
    return %arg0, %c0_i32 : i32, i32
  }
  func.func @transform_1(%arg0: i32) -> (i32, i32) {
    %c0_i32 = arith.constant 0 : i32
    %c0_i32_0 = arith.constant 0 : i32
    %c0_i32_1 = arith.constant 0 : i32
    return %c0_i32, %c0_i32_0 : i32, i32
  }
  func.func @transform_2(%arg0: i32) -> (i32, i32) {
    %c0_i32 = arith.constant 0 : i32
    %c0_i32_0 = arith.constant 0 : i32
    %c0_i32_1 = arith.constant 0 : i32
    return %c0_i32, %c0_i32_0 : i32, i32
  }
  func.func @transform_3(%arg0: i32) -> (i32, i32) {
    %c0_i32 = arith.constant 0 : i32
    %c0_i32_0 = arith.constant 0 : i32
    %c0_i32_1 = arith.constant 0 : i32
    return %c0_i32, %c0_i32_0 : i32, i32
  }
  func.func @transform_4(%arg0: i32) -> (i32, i32) {
    %c0_i32 = arith.constant 0 : i32
    %c0_i32_0 = arith.constant 0 : i32
    %c0_i32_1 = arith.constant 0 : i32
    return %c0_i32, %c0_i32_0 : i32, i32
  }
  func.func @transform_5(%arg0: i32) -> (i32, i32) {
    %c0_i32 = arith.constant 0 : i32
    %c0_i32_0 = arith.constant 0 : i32
    return %arg0, %c0_i32 : i32, i32
  }
}

</mosaic_0001>

<bundles_post_ra>
// kernel: tpu_custom_call.1
= control target key start
LH: loop header
LB: loop body
LE: loop exit
PB: predicated region body
PF: predicated region fallthrough
CT: control target
= control target key end

     0   :  { %vm40_vm0 = vcmask 261120   ;;  %vm178_vm1 = vcmask 523264   ;;  %s1319_s1 = inlined_call_operand.vmem [shape: f32[32,64], index: 1, kind: input, shape index: {}]   ;;  %s1320_s0 = inlined_call_operand.vmem [shape: f32[128,32], index: 0, kind: input, shape index: {}]   ;;  %s1321_s2 = inlined_call_operand.vmem [shape: f32[64,32], index: 2, kind: input, shape index: {}]   ;;  %s1322_s3 = inlined_call_operand.vmem [shape: f32[1,32], index: 3, kind: input, shape index: {}]   ;;  %s1323_s4 = inlined_call_operand.vmem [shape: f32[1,32], index: 4, kind: input, shape index: {}]   ;;  %s1324_s5 = inlined_call_operand.vmem [shape: f32[128,32], index: 5, kind: output, shape index: {}]  }
   0x1   :  { %v39_v0 = vld [vmem:[%s1319_s1 + $0x18] sm:$0xff]  ;;  %v38_v1 = vld [vmem:[%s1319_s1 + $0x10] sm:$0xff]  ;;  %v37_v2 = vld [vmem:[%s1319_s1 + $0x8] sm:$0xff] }
   0x2   :  { %101 = vmatpush.msra.mxu0 %v39_v0  ;;  %743 = vmatpush.msra.mxu3 %v39_v0  ;;  %v36_v3 = vld [vmem:[%s1319_s1] sm:$0xff]  ;;  %v845_v5 = vld [vmem:[%s1320_s0 + $0x8] sm:$0xff]  ;;  %v852_v6 = vld [vmem:[%s1320_s0 + $0x10] sm:$0xff] }
   0x3   :  { %v838_v4 = vld [vmem:[%s1320_s0] sm:$0xff]  ;;  %v859_v7 = vld [vmem:[%s1320_s0 + $0x18] sm:$0xff]  ;;  %v873_v9 = vld [vmem:[%s1320_s0 + $0x48] sm:$0xff] }
   0x4   :  { %102 = vmatpush.msra.mxu0 %v38_v1  ;;  %744 = vmatpush.msra.mxu3 %v38_v1  ;;  %v866_v8 = vld [vmem:[%s1320_s0 + $0x20] sm:$0xff]  ;;  %v880_v10 = vld [vmem:[%s1320_s0 + $0x28] sm:$0xff]  ;;  %v885_v11 = vld [vmem:[%s1320_s0 + $0x50] sm:$0xff] }
   0x5   :  { %v177_v12 = vld [vmem:[%s1321_s2 + $0x38] sm:$0xff]  ;;  %v897_v13 = vld [vmem:[%s1320_s0 + $0x30] sm:$0xff]  ;;  %v175_v16 = vld [vmem:[%s1321_s2 + $0x28] sm:$0xff] }
   0x6   :  { %103 = vmatpush.msra.mxu0 %v37_v2  ;;  %745 = vmatpush.msra.mxu3 %v37_v2  ;;  %v902_v14 = vld [vmem:[%s1320_s0 + $0x58] sm:$0xff]  ;;  %v176_v15 = vld [vmem:[%s1321_s2 + $0x30] sm:$0xff]  ;;  %v174_v17 = vld [vmem:[%s1321_s2 + $0x20] sm:$0xff] }
   0x7   :  { %235 = vmatpush.msra.mxu1 %v177_v12  ;;  %747 = vmatpush.msra.mxu2 %v177_v12  ;;  %v920_v18 = vld [vmem:[%s1320_s0 + $0x38] sm:$0xff]  ;;  %v928_v20 = vld [vmem:[%s1320_s0 + $0x60] sm:$0xff]  ;;  %v172_v21 = vld [vmem:[%s1321_s2 + $0x10] sm:$0xff] }
   0x8   :  { %104 = vmatpush.msra.mxu0 %v36_v3  ;;  %746 = vmatpush.msra.mxu3 %v36_v3  ;;  %v173_v19 = vld [vmem:[%s1321_s2 + $0x18] sm:$0xff]  ;;  %v940_v22 = vld [vmem:[%s1320_s0 + $0x40] sm:$0xff]  ;;  %v945_v23 = vld [vmem:[%s1320_s0 + $0x68] sm:$0xff] }
   0x9   :  { %711 = vmatmul.msk.f32.vlgmr.msra.gmra.mxu0 %vm40_vm0, %v838_v4  ;;  %720 = vmatmul.msk.f32.vlgmr.msra.gmra.mxu3 %vm40_vm0, %v873_v9  ;;  %v954_v24 = vld [vmem:[%s1320_s0 + $0x70] sm:$0xff]  ;;  %v961_v25 = vld [vmem:[%s1320_s0 + $0x78] sm:$0xff]  ;;  %v171_v26 = vld [vmem:[%s1321_s2 + $0x8] sm:$0xff] }
   0xa   :  { %236 = vmatpush.msra.mxu1 %v176_v15  ;;  %748 = vmatpush.msra.mxu2 %v176_v15  ;;  %v170_v27 = vld [vmem:[%s1321_s2] sm:$0xff] }
   0xc   :  { %237 = vmatpush.msra.mxu1 %v175_v16  ;;  %749 = vmatpush.msra.mxu2 %v175_v16 }
   0xe   :  { %238 = vmatpush.msra.mxu1 %v174_v17  ;;  %750 = vmatpush.msra.mxu2 %v174_v17 }
  0x10   :  { %239 = vmatpush.msra.mxu1 %v173_v19  ;;  %751 = vmatpush.msra.mxu2 %v173_v19 }
  0x11   :  { %712 = vmatmul.msk.f32.gmra.mxu0 %vm40_vm0, %v845_v5  ;;  %721 = vmatmul.msk.f32.gmra.mxu3 %vm40_vm0, %v885_v11 }
  0x12   :  { %240 = vmatpush.msra.mxu1 %v172_v21  ;;  %752 = vmatpush.msra.mxu2 %v172_v21 }
  0x14   :  { %241 = vmatpush.msra.mxu1 %v171_v26  ;;  %753 = vmatpush.msra.mxu2 %v171_v26 }
  0x16   :  { %242 = vmatpush.msra.mxu1 %v170_v27  ;;  %754 = vmatpush.msra.mxu2 %v170_v27 }
  0x19   :  { %713 = vmatmul.msk.f32.gmra.mxu0 %vm40_vm0, %v852_v6  ;;  %722 = vmatmul.msk.f32.gmra.mxu3 %vm40_vm0, %v902_v14 }
  0x21   :  { %714 = vmatmul.msk.f32.gmra.mxu0 %vm40_vm0, %v859_v7  ;;  %723 = vmatmul.msk.f32.gmra.mxu3 %vm40_vm0, %v928_v20 }
  0x29   :  { %715 = vmatmul.msk.f32.gmra.mxu0 %vm40_vm0, %v866_v8  ;;  %724 = vmatmul.msk.f32.gmra.mxu3 %vm40_vm0, %v945_v23 }
  0x31   :  { %716 = vmatmul.msk.f32.gmra.mxu0 %vm40_vm0, %v880_v10  ;;  %725 = vmatmul.msk.f32.gmra.mxu3 %vm40_vm0, %v954_v24 }
  0x39   :  { %717 = vmatmul.msk.f32.gmra.mxu0 %vm40_vm0, %v897_v13  ;;  %726 = vmatmul.msk.f32.gmra.mxu3 %vm40_vm0, %v961_v25 }
  0x41   :  { %718 = vmatmul.msk.f32.gmra.mxu0 %vm40_vm0, %v920_v18 }
  0x49   :  { %719 = vmatmul.msk.f32.gmra.mxu0 %vm40_vm0, %v940_v22 }
  0x86   :  { %v106_v28 = vpop.f32.mrf.mxu0 }
  0x87   :  { %v154_v29 = vmax.f32 %v106_v28, 0.0 }
  0x89   :  { %727 = vmatmul.msk.f32.vlgmr.msra.gmra.mxu1 %vm178_vm1, %v154_v29 }
  0x8c   :  { %v133_v43 = vpop.f32.mrf.mxu3 }
  0x8d   :  { %v163_v48 = vmax.f32 %v133_v43, 0.0 }
  0x8e   :  { %v109_v30 = vpop.f32.mrf.mxu0 }
  0x8f   :  { %v155_v31 = vmax.f32 %v109_v30, 0.0 }
  0x91   :  { %728 = vmatmul.msk.f32.gmra.mxu1 %vm178_vm1, %v155_v31 }
  0x94   :  { %v136_v47 = vpop.f32.mrf.mxu3 }
  0x95   :  { %v164_v50 = vmax.f32 %v136_v47, 0.0 }
  0x96   :  { %v112_v32 = vpop.f32.mrf.mxu0 }
  0x97   :  { %v156_v33 = vmax.f32 %v112_v32, 0.0 }
  0x99   :  { %729 = vmatmul.msk.f32.gmra.mxu1 %vm178_vm1, %v156_v33 }
  0x9c   :  { %v139_v49 = vpop.f32.mrf.mxu3 }
  0x9d   :  { %v165_v52 = vmax.f32 %v139_v49, 0.0 }
  0x9e   :  { %v115_v34 = vpop.f32.mrf.mxu0 }
  0x9f   :  { %v157_v35 = vmax.f32 %v115_v34, 0.0 }
  0xa1   :  { %730 = vmatmul.msk.f32.gmra.mxu1 %vm178_vm1, %v157_v35 }
  0xa4   :  { %v142_v51 = vpop.f32.mrf.mxu3 }
  0xa5   :  { %v166_v53 = vmax.f32 %v142_v51, 0.0 }
  0xa6   :  { %v118_v36 = vpop.f32.mrf.mxu0 }
  0xa7   :  { %v158_v37 = vmax.f32 %v118_v36, 0.0  ;;  %v792_v36 = vmov 32.0  }
  0xa8   :  { %758 = vrcp.f32 %v792_v36 }
  0xa9   :  { %731 = vmatmul.msk.f32.gmra.mxu1 %vm178_vm1, %v158_v37 }
  0xac   :  { %v145_v54 = vpop.f32.mrf.mxu3 }
  0xad   :  { %v167_v55 = vmax.f32 %v145_v54, 0.0 }
  0xae   :  { %v121_v38 = vpop.f32.mrf.mxu0 }
  0xaf   :  { %v159_v39 = vmax.f32 %v121_v38, 0.0 }
  0xb1   :  { %732 = vmatmul.msk.f32.gmra.mxu1 %vm178_vm1, %v159_v39  ;;  %v759_v39 = vpop.eup %758 }
  0xb2   :  { %vm345_vm2 = vweird.f32 %v759_v39 }
  0xb4   :  { %v148_v56 = vpop.f32.mrf.mxu3 }
  0xb5   :  { %v168_v57 = vmax.f32 %v148_v56, 0.0 }
  0xb6   :  { %v124_v40 = vpop.f32.mrf.mxu0 }
  0xb7   :  { %v160_v41 = vmax.f32 %v124_v40, 0.0  ;;  %v341_v40 = vmul.f32 32.0, %v759_v39 }
  0xb9   :  { %733 = vmatmul.msk.f32.gmra.mxu1 %vm178_vm1, %v160_v41  ;;  %v342_v43 = vsub.f32 1.0, %v341_v40 }
  0xbc   :  { %v151_v58 = vpop.f32.mrf.mxu3 }
  0xbd   :  { %v169_v59 = vmax.f32 %v151_v58, 0.0 }
  0xbe   :  { %v127_v42 = vpop.f32.mrf.mxu0 }
  0xbf   :  { %v161_v44 = vmax.f32 %v127_v42, 0.0 }
  0xc1   :  { %734 = vmatmul.msk.f32.gmra.mxu1 %vm178_vm1, %v161_v44  ;;  %v343_v44 = vmul.f32 %v759_v39, %v342_v43 }
  0xc3   :  { %v344_v47 = vadd.f32 %v759_v39, %v343_v44 }
  0xc6   :  { %v130_v45 = vpop.f32.mrf.mxu0 }
  0xc7   :  { %v162_v46 = vmax.f32 %v130_v45, 0.0 }
  0xc9   :  { %735 = vmatmul.msk.f32.vlgmr.msra.gmra.mxu2 %vm178_vm1, %v162_v46 }
  0xd1   :  { %736 = vmatmul.msk.f32.gmra.mxu2 %vm178_vm1, %v163_v48  ;;  %v1057_v48 = vsel %vm345_vm2, %v759_v39, %v344_v47 }
  0xd9   :  { %737 = vmatmul.msk.f32.gmra.mxu2 %vm178_vm1, %v164_v50 }
  0xe1   :  { %738 = vmatmul.msk.f32.gmra.mxu2 %vm178_vm1, %v165_v52 }
  0xe9   :  { %739 = vmatmul.msk.f32.gmra.mxu2 %vm178_vm1, %v166_v53 }
  0xf1   :  { %740 = vmatmul.msk.f32.gmra.mxu2 %vm178_vm1, %v167_v55 }
  0xf9   :  { %741 = vmatmul.msk.f32.gmra.mxu2 %vm178_vm1, %v168_v57 }
 0x101   :  { %742 = vmatmul.msk.f32.gmra.mxu2 %vm178_vm1, %v169_v59 }
 0x106   :  { %v244_v60 = vpop.f32.mrf.mxu1 }
 0x107   :  { %v988_v61 = vadd.f32 %v244_v60, %v838_v4 }
 0x109   :  { %v292_v62 = vsel %vm40_vm0, %v988_v61, 0.0 }
 0x10a   :  { %293 = vadd.xlane.f32.xlu0 %v292_v62 }
 0x10e   :  { %v247_v63 = vpop.f32.mrf.mxu1 }
 0x10f   :  { %v993_v0 = vadd.f32 %v247_v63, %v845_v5 }
 0x111   :  { %v295_v1 = vsel %vm40_vm0, %v993_v0, 0.0 }
 0x112   :  { %296 = vadd.xlane.f32.xlu0 %v295_v1 }
 0x116   :  { %v250_v2 = vpop.f32.mrf.mxu1 }
 0x117   :  { %v998_v3 = vadd.f32 %v250_v2, %v852_v6 }
 0x119   :  { %v298_v4 = vsel %vm40_vm0, %v998_v3, 0.0 }
 0x11a   :  { %299 = vadd.xlane.f32.xlu1 %v298_v4 }
 0x11e   :  { %v253_v12 = vpop.f32.mrf.mxu1 }
 0x11f   :  { %v1003_v15 = vadd.f32 %v253_v12, %v859_v7 }
 0x121   :  { %v301_v5 = vsel %vm40_vm0, %v1003_v15, 0.0 }
 0x122   :  { %302 = vadd.xlane.f32.xlu1 %v301_v5 }
 0x126   :  { %v256_v16 = vpop.f32.mrf.mxu1 }
 0x127   :  { %v1008_v17 = vadd.f32 %v256_v16, %v866_v8 }
 0x129   :  { %v304_v6 = vsel %vm40_vm0, %v1008_v17, 0.0 }
 0x12a   :  { %305 = vadd.xlane.f32.xlu2 %v304_v6 }
 0x12e   :  { %v259_v19 = vpop.f32.mrf.mxu1 }
 0x12f   :  { %v1013_v21 = vadd.f32 %v259_v19, %v880_v10 }
 0x131   :  { %v307_v7 = vsel %vm40_vm0, %v1013_v21, 0.0 }
 0x132   :  { %308 = vadd.xlane.f32.xlu2 %v307_v7 }
 0x136   :  { %v262_v26 = vpop.f32.mrf.mxu1 }
 0x137   :  { %v1018_v27 = vadd.f32 %v262_v26, %v897_v13 }
 0x139   :  { %v310_v8 = vsel %vm40_vm0, %v1018_v27, 0.0 }
 0x13a   :  { %311 = vadd.xlane.f32.xlu0 %v310_v8 }
 0x13e   :  { %v265_v28 = vpop.f32.mrf.mxu1 }
 0x13f   :  { %v1023_v29 = vadd.f32 %v265_v28, %v920_v18 }
 0x141   :  { %v313_v10 = vsel %vm40_vm0, %v1023_v29, 0.0 }
 0x142   :  { %314 = vadd.xlane.f32.xlu1 %v313_v10 }
 0x14c   :  { %v268_v30 = vpop.f32.mrf.mxu2 }
 0x14d   :  { %v1028_v31 = vadd.f32 %v268_v30, %v940_v22 }
 0x14f   :  { %v316_v13 = vsel %vm40_vm0, %v1028_v31, 0.0 }
 0x150   :  { %317 = vadd.xlane.f32.xlu2 %v316_v13 }
 0x154   :  { %v271_v32 = vpop.f32.mrf.mxu2 }
 0x155   :  { %v1033_v33 = vadd.f32 %v271_v32, %v873_v9 }
 0x157   :  { %v319_v18 = vsel %vm40_vm0, %v1033_v33, 0.0 }
 0x158   :  { %320 = vadd.xlane.f32.xlu0 %v319_v18 }
 0x15c   :  { %v274_v34 = vpop.f32.mrf.mxu2 }
 0x15d   :  { %v1038_v35 = vadd.f32 %v274_v34, %v885_v11 }
 0x15f   :  { %v322_v22 = vsel %vm40_vm0, %v1038_v35, 0.0 }
 0x160   :  { %323 = vadd.xlane.f32.xlu1 %v322_v22 }
 0x164   :  { %v277_v37 = vpop.f32.mrf.mxu2 }
 0x165   :  { %v1043_v38 = vadd.f32 %v277_v37, %v902_v14 }
 0x167   :  { %v325_v9 = vsel %vm40_vm0, %v1043_v38, 0.0 }
 0x168   :  { %326 = vadd.xlane.f32.xlu2 %v325_v9 }
 0x16c   :  { %v280_v41 = vpop.f32.mrf.mxu2 }
 0x16d   :  { %v1048_v11 = vadd.f32 %v280_v41, %v928_v20 }
 0x16f   :  { %v328_v42 = vsel %vm40_vm0, %v1048_v11, 0.0 }
 0x170   :  { %329 = vadd.xlane.f32.xlu0 %v328_v42 }
 0x174   :  { %v283_v45 = vpop.f32.mrf.mxu2 }
 0x175   :  { %v1053_v14 = vadd.f32 %v283_v45, %v945_v23 }
 0x177   :  { %v331_v46 = vsel %vm40_vm0, %v1053_v14, 0.0 }
 0x178   :  { %332 = vadd.xlane.f32.xlu1 %v331_v46 }
 0x17c   :  { %v286_v20 = vpop.f32.mrf.mxu2 }
 0x17d   :  { %v1060_v49 = vadd.f32 %v286_v20, %v954_v24  ;;  %v294_v50 = vpop.xlane.xlu0 %293 }
 0x17e   :  { %v347_v51 = vmul.f32 %v1057_v48, %v294_v50 }
 0x17f   :  { %v334_v52 = vsel %vm40_vm0, %v1060_v49, 0.0 }
 0x180   :  { %v1066_v23 = vsub.f32 %v988_v61, %v347_v51  ;;  %335 = vadd.xlane.f32.xlu2 %v334_v52 }
 0x182   :  { %v379_v53 = vmul.f32 %v1066_v23, %v1066_v23 }
 0x184   :  { %v289_v54 = vpop.f32.mrf.mxu2  ;;  %v395_v55 = vsel %vm40_vm0, %v379_v53, 0.0 }
 0x185   :  { %v1072_v56 = vadd.f32 %v289_v54, %v961_v25  ;;  %v297_v24 = vpop.xlane.xlu0 %296  ;;  %396 = vadd.xlane.f32.xlu1 %v395_v55 }
 0x186   :  { %v348_v57 = vmul.f32 %v1057_v48, %v297_v24 }
 0x187   :  { %v337_v58 = vsel %vm40_vm0, %v1072_v56, 0.0 }
 0x188   :  { %v1078_v59 = vsub.f32 %v993_v0, %v348_v57  ;;  %338 = vadd.xlane.f32.xlu0 %v337_v58 }
 0x18a   :  { %v380_v60 = vmul.f32 %v1078_v59, %v1078_v59 }
 0x18c   :  { %v398_v61 = vsel %vm40_vm0, %v380_v60, 0.0 }
 0x18d   :  { %v300_v62 = vpop.xlane.xlu1 %299  ;;  %399 = vadd.xlane.f32.xlu2 %v398_v61 }
 0x18e   :  { %v349_v25 = vmul.f32 %v1057_v48, %v300_v62 }
 0x190   :  { %v1085_v63 = vsub.f32 %v998_v3, %v349_v25 }
 0x192   :  { %v381_v1 = vmul.f32 %v1085_v63, %v1085_v63 }
 0x194   :  { %v401_v2 = vsel %vm40_vm0, %v381_v1, 0.0 }
 0x195   :  { %v303_v0 = vpop.xlane.xlu1 %302  ;;  %402 = vadd.xlane.f32.xlu0 %v401_v2 }
 0x196   :  { %v350_v4 = vmul.f32 %v1057_v48, %v303_v0 }
 0x198   :  { %v1092_v12 = vsub.f32 %v1003_v15, %v350_v4 }
 0x19a   :  { %v382_v5 = vmul.f32 %v1092_v12, %v1092_v12 }
 0x19c   :  { %v404_v16 = vsel %vm40_vm0, %v382_v5, 0.0 }
 0x19d   :  { %v306_v6 = vpop.xlane.xlu2 %305  ;;  %405 = vadd.xlane.f32.xlu1 %v404_v16 }
 0x19e   :  { %v351_v3 = vmul.f32 %v1057_v48, %v306_v6 }
 0x1a0   :  { %v1099_v19 = vsub.f32 %v1008_v17, %v351_v3 }
 0x1a2   :  { %v383_v7 = vmul.f32 %v1099_v19, %v1099_v19 }
 0x1a4   :  { %v407_v26 = vsel %vm40_vm0, %v383_v7, 0.0 }
 0x1a5   :  { %v309_v8 = vpop.xlane.xlu2 %308  ;;  %408 = vadd.xlane.f32.xlu2 %v407_v26 }
 0x1a6   :  { %v352_v15 = vmul.f32 %v1057_v48, %v309_v8 }
 0x1a8   :  { %v1106_v28 = vsub.f32 %v1013_v21, %v352_v15 }
 0x1aa   :  { %v384_v10 = vmul.f32 %v1106_v28, %v1106_v28 }
 0x1ac   :  { %v410_v30 = vsel %vm40_vm0, %v384_v10, 0.0 }
 0x1ad   :  { %v312_v13 = vpop.xlane.xlu0 %311  ;;  %411 = vadd.xlane.f32.xlu0 %v410_v30 }
 0x1ae   :  { %v353_v17 = vmul.f32 %v1057_v48, %v312_v13 }
 0x1b0   :  { %v1113_v32 = vsub.f32 %v1018_v27, %v353_v17 }
 0x1b2   :  { %v385_v18 = vmul.f32 %v1113_v32, %v1113_v32 }
 0x1b4   :  { %v413_v34 = vsel %vm40_vm0, %v385_v18, 0.0 }
 0x1b5   :  { %v315_v22 = vpop.xlane.xlu1 %314  ;;  %414 = vadd.xlane.f32.xlu1 %v413_v34 }
 0x1b6   :  { %v354_v21 = vmul.f32 %v1057_v48, %v315_v22 }
 0x1b8   :  { %v1120_v36 = vsub.f32 %v1023_v29, %v354_v21 }
 0x1ba   :  { %v386_v37 = vmul.f32 %v1120_v36, %v1120_v36 }
 0x1bc   :  { %v416_v9 = vsel %vm40_vm0, %v386_v37, 0.0 }
 0x1bd   :  { %417 = vadd.xlane.f32.xlu2 %v416_v9  ;;  %v1187_v9 = vld [vmem:[%s1322_s3] ss:$0 sm:$0xff] }
 0x1c3   :  { %v318_v27 = vpop.xlane.xlu2 %317 }
 0x1c4   :  { %v355_v39 = vmul.f32 %v1057_v48, %v318_v27 }
 0x1c6   :  { %v1127_v40 = vsub.f32 %v1028_v31, %v355_v39 }
 0x1c8   :  { %v387_v41 = vmul.f32 %v1127_v40, %v1127_v40 }
 0x1ca   :  { %v419_v42 = vsel %vm40_vm0, %v387_v41, 0.0 }
 0x1cb   :  { %v321_v43 = vpop.xlane.xlu0 %320  ;;  %420 = vadd.xlane.f32.xlu0 %v419_v42 }
 0x1cc   :  { %v356_v29 = vmul.f32 %v1057_v48, %v321_v43 }
 0x1ce   :  { %v1134_v44 = vsub.f32 %v1033_v33, %v356_v29  ;;  %v1192_v29 = vld [vmem:[%s1323_s4] ss:$0 sm:$0xff] }
 0x1d0   :  { %v388_v45 = vmul.f32 %v1134_v44, %v1134_v44 }
 0x1d2   :  { %v422_v46 = vsel %vm40_vm0, %v388_v45, 0.0 }
 0x1d3   :  { %v324_v47 = vpop.xlane.xlu1 %323  ;;  %423 = vadd.xlane.f32.xlu1 %v422_v46 }
 0x1d4   :  { %v357_v31 = vmul.f32 %v1057_v48, %v324_v47 }
 0x1d6   :  { %v1141_v20 = vsub.f32 %v1038_v35, %v357_v31 }
 0x1d8   :  { %v389_v50 = vmul.f32 %v1141_v20, %v1141_v20 }
 0x1da   :  { %v425_v51 = vsel %vm40_vm0, %v389_v50, 0.0 }
 0x1db   :  { %426 = vadd.xlane.f32.xlu2 %v425_v51  ;;  %v327_v33 = vpop.xlane.xlu2 %326 }
 0x1dc   :  { %v358_v52 = vmul.f32 %v1057_v48, %v327_v33 }
 0x1de   :  { %v1148_v53 = vsub.f32 %v1043_v38, %v358_v52 }
 0x1e0   :  { %v390_v54 = vmul.f32 %v1148_v53, %v1148_v53 }
 0x1e2   :  { %v428_v55 = vsel %vm40_vm0, %v390_v54, 0.0 }
 0x1e3   :  { %v330_v24 = vpop.xlane.xlu0 %329  ;;  %429 = vadd.xlane.f32.xlu0 %v428_v55 }
 0x1e4   :  { %v359_v35 = vmul.f32 %v1057_v48, %v330_v24 }
 0x1e6   :  { %v1155_v57 = vsub.f32 %v1048_v11, %v359_v35 }
 0x1e8   :  { %v391_v58 = vmul.f32 %v1155_v57, %v1155_v57 }
 0x1ea   :  { %v431_v60 = vsel %vm40_vm0, %v391_v58, 0.0 }
 0x1eb   :  { %v333_v61 = vpop.xlane.xlu1 %332  ;;  %432 = vadd.xlane.f32.xlu1 %v431_v60 }
 0x1ec   :  { %v360_v38 = vmul.f32 %v1057_v48, %v333_v61 }
 0x1ee   :  { %v1162_v62 = vsub.f32 %v1053_v14, %v360_v38 }
 0x1f0   :  { %v392_v25 = vmul.f32 %v1162_v62, %v1162_v62 }
 0x1f2   :  { %v434_v1 = vsel %vm40_vm0, %v392_v25, 0.0 }
 0x1f3   :  { %435 = vadd.xlane.f32.xlu2 %v434_v1  ;;  %v336_v11 = vpop.xlane.xlu2 %335 }
 0x1f4   :  { %v361_v2 = vmul.f32 %v1057_v48, %v336_v11 }
 0x1f6   :  { %v1169_v0 = vsub.f32 %v1060_v49, %v361_v2 }
 0x1f8   :  { %v397_v4 = vpop.xlane.xlu1 %396  ;;  %v393_v5 = vmul.f32 %v1169_v0, %v1169_v0 }
 0x1f9   :  { %v443_v16 = vmul.f32 %v397_v4, %v1057_v48 }
 0x1fa   :  { %v437_v14 = vsel %vm40_vm0, %v393_v5, 0.0 }
 0x1fb   :  { %v460_v6 = vadd.f32 1e-05, %v443_v16  ;;  %v339_v3 = vpop.xlane.xlu0 %338  ;;  %438 = vadd.xlane.f32.xlu0 %v437_v14 }
 0x1fc   :  { %v362_v7 = vmul.f32 %v1057_v48, %v339_v3 }
 0x1fd   :  { %760 = vrsqrt.f32 %v460_v6  ;;  %vm482_vm4 = vweird.f32 %v460_v6 }
 0x1fe   :  { %v1177_v26 = vsub.f32 %v1072_v56, %v362_v7 }
 0x200   :  { %v400_v8 = vpop.xlane.xlu2 %399  ;;  %v394_v49 = vmul.f32 %v1177_v26, %v1177_v26 }
 0x201   :  { %v444_v15 = vmul.f32 %v400_v8, %v1057_v48 }
 0x202   :  { %v440_v10 = vsel %vm40_vm0, %v394_v49, 0.0 }
 0x203   :  { %v761_v30 = vpop.eup %760  ;;  %v461_v13 = vadd.f32 1e-05, %v444_v15  ;;  %441 = vadd.xlane.f32.xlu1 %v440_v10 }
 0x204   :  { %v477_v17 = vmul.f32 %v761_v30, %v460_v6  ;;  %vm483_vm3 = vweird.f32 %v761_v30 }
 0x205   :  { %762 = vrsqrt.f32 %v461_v13  ;;  %vm484_vm5 = vmor %vm482_vm4, %vm483_vm3  ;;  %vm492_vm7 = vweird.f32 %v461_v13 }
 0x206   :  { %v478_v18 = vmul.f32 %v761_v30, %v477_v17 }
 0x208   :  { %v479_v34 = vmul.f32 0.5, %v478_v18  ;;  %v403_v22 = vpop.xlane.xlu0 %402 }
 0x209   :  { %v445_v21 = vmul.f32 %v403_v22, %v1057_v48 }
 0x20a   :  { %v480_v56 = vsub.f32 1.5, %v479_v34 }
 0x20b   :  { %v763_v37 = vpop.eup %762  ;;  %v462_v27 = vadd.f32 1e-05, %v445_v21 }
 0x20c   :  { %v481_v39 = vmul.f32 %v761_v30, %v480_v56  ;;  %v487_v41 = vmul.f32 %v763_v37, %v461_v13  ;;  %vm493_vm6 = vweird.f32 %v763_v37 }
 0x20d   :  { %764 = vrsqrt.f32 %v462_v27  ;;  %vm494_vm8 = vmor %vm492_vm7, %vm493_vm6  ;;  %vm502_vm10 = vweird.f32 %v462_v27 }
 0x20e   :  { %v485_v42 = vsel %vm484_vm5, %v761_v30, %v481_v39  ;;  %v488_v43 = vmul.f32 %v763_v37, %v487_v41 }
 0x20f   :  { %v639_v45 = vmul.f32 %v1187_v9, %v485_v42 }
 0x210   :  { %v489_v46 = vmul.f32 0.5, %v488_v43  ;;  %v406_v47 = vpop.xlane.xlu1 %405 }
 0x211   :  { %v655_v31 = vmul.f32 %v639_v45, %v1066_v23  ;;  %v446_v50 = vmul.f32 %v406_v47, %v1057_v48 }
 0x212   :  { %v490_v51 = vsub.f32 1.5, %v489_v46 }
 0x213   :  { %v765_v33 = vpop.eup %764  ;;  %v675_v52 = vadd.f32 %v1192_v29, %v655_v31  ;;  %v463_v54 = vadd.f32 1e-05, %v446_v50 }
 0x214   :  { %v491_v55 = vmul.f32 %v763_v37, %v490_v51  ;;  %v497_v24 = vmul.f32 %v765_v33, %v462_v27  ;;  %vm503_vm9 = vweird.f32 %v765_v33 }
 0x215   :  { %691 = vst.msk [vmem:[%s1324_s5] sm:$0xff] %vm40_vm0, %v675_v52  ;;  %766 = vrsqrt.f32 %v463_v54  ;;  %vm504_vm11 = vmor %vm502_vm10, %vm503_vm9  ;;  %vm512_vm13 = vweird.f32 %v463_v54 }
 0x216   :  { %v495_v35 = vsel %vm494_vm8, %v763_v37, %v491_v55  ;;  %v498_v23 = vmul.f32 %v765_v33, %v497_v24 }
 0x217   :  { %v640_v58 = vmul.f32 %v1187_v9, %v495_v35 }
 0x218   :  { %v499_v60 = vmul.f32 0.5, %v498_v23  ;;  %v409_v61 = vpop.xlane.xlu2 %408 }
 0x219   :  { %v656_v38 = vmul.f32 %v640_v58, %v1078_v59  ;;  %v447_v25 = vmul.f32 %v409_v61, %v1057_v48 }
 0x21a   :  { %v500_v1 = vsub.f32 1.5, %v499_v60 }
 0x21b   :  { %v767_v11 = vpop.eup %766  ;;  %v676_v2 = vadd.f32 %v1192_v29, %v656_v38  ;;  %v464_v4 = vadd.f32 1e-05, %v447_v25 }
 0x21c   :  { %v501_v5 = vmul.f32 %v765_v33, %v500_v1  ;;  %v507_v16 = vmul.f32 %v767_v11, %v463_v54  ;;  %vm513_vm12 = vweird.f32 %v767_v11 }
 0x21d   :  { %692 = vst.msk [vmem:[%s1324_s5 + $0x8] sm:$0xff] %vm40_vm0, %v676_v2  ;;  %768 = vrsqrt.f32 %v464_v4  ;;  %vm514_vm14 = vmor %vm512_vm13, %vm513_vm12  ;;  %vm522_vm1 = vweird.f32 %v464_v4 }
 0x21e   :  { %v505_v14 = vsel %vm504_vm11, %v765_v33, %v501_v5  ;;  %v508_v59 = vmul.f32 %v767_v11, %v507_v16 }
 0x21f   :  { %v641_v6 = vmul.f32 %v1187_v9, %v505_v14 }
 0x220   :  { %v509_v3 = vmul.f32 0.5, %v508_v59  ;;  %v412_v7 = vpop.xlane.xlu0 %411 }
 0x221   :  { %v657_v8 = vmul.f32 %v641_v6, %v1085_v63  ;;  %v448_v49 = vmul.f32 %v412_v7, %v1057_v48 }
 0x222   :  { %v510_v15 = vsub.f32 1.5, %v509_v3 }
 0x223   :  { %v769_v10 = vpop.eup %768  ;;  %v677_v30 = vadd.f32 %v1192_v29, %v657_v8  ;;  %v465_v13 = vadd.f32 1e-05, %v448_v49 }
 0x224   :  { %v511_v17 = vmul.f32 %v767_v11, %v510_v15  ;;  %v517_v18 = vmul.f32 %v769_v10, %v464_v4  ;;  %vm523_vm15 = vweird.f32 %v769_v10 }
 0x225   :  { %693 = vst.msk [vmem:[%s1324_s5 + $0x10] sm:$0xff] %vm40_vm0, %v677_v30  ;;  %770 = vrsqrt.f32 %v465_v13  ;;  %vm524_vm2 = vmor %vm522_vm1, %vm523_vm15  ;;  %vm532_vm4 = vweird.f32 %v465_v13 }
 0x226   :  { %v515_v34 = vsel %vm514_vm14, %v767_v11, %v511_v17  ;;  %v518_v63 = vmul.f32 %v769_v10, %v517_v18 }
 0x227   :  { %v642_v22 = vmul.f32 %v1187_v9, %v515_v34 }
 0x228   :  { %v519_v21 = vmul.f32 0.5, %v518_v63  ;;  %v415_v56 = vpop.xlane.xlu1 %414 }
 0x229   :  { %v658_v37 = vmul.f32 %v642_v22, %v1092_v12  ;;  %v449_v27 = vmul.f32 %v415_v56, %v1057_v48 }
 0x22a   :  { %v520_v39 = vsub.f32 1.5, %v519_v21 }
 0x22b   :  { %v771_v41 = vpop.eup %770  ;;  %v678_v42 = vadd.f32 %v1192_v29, %v658_v37  ;;  %v466_v43 = vadd.f32 1e-05, %v449_v27 }
 0x22c   :  { %v521_v45 = vmul.f32 %v769_v10, %v520_v39  ;;  %v527_v46 = vmul.f32 %v771_v41, %v465_v13  ;;  %vm533_vm3 = vweird.f32 %v771_v41 }
 0x22d   :  { %694 = vst.msk [vmem:[%s1324_s5 + $0x18] sm:$0xff] %vm40_vm0, %v678_v42  ;;  %772 = vrsqrt.f32 %v466_v43  ;;  %vm534_vm5 = vmor %vm532_vm4, %vm533_vm3  ;;  %vm542_vm7 = vweird.f32 %v466_v43 }
 0x22e   :  { %v525_v47 = vsel %vm524_vm2, %v769_v10, %v521_v45  ;;  %v528_v12 = vmul.f32 %v771_v41, %v527_v46 }
 0x22f   :  { %v643_v31 = vmul.f32 %v1187_v9, %v525_v47 }
 0x230   :  { %v529_v50 = vmul.f32 0.5, %v528_v12  ;;  %v418_v51 = vpop.xlane.xlu2 %417 }
 0x231   :  { %v659_v33 = vmul.f32 %v643_v31, %v1099_v19  ;;  %v450_v52 = vmul.f32 %v418_v51, %v1057_v48 }
 0x232   :  { %v530_v54 = vsub.f32 1.5, %v529_v50 }
 0x233   :  { %v773_v55 = vpop.eup %772  ;;  %v679_v24 = vadd.f32 %v1192_v29, %v659_v33  ;;  %v467_v35 = vadd.f32 1e-05, %v450_v52 }
 0x234   :  { %v531_v23 = vmul.f32 %v771_v41, %v530_v54  ;;  %v537_v58 = vmul.f32 %v773_v55, %v466_v43  ;;  %vm543_vm6 = vweird.f32 %v773_v55 }
 0x235   :  { %695 = vst.msk [vmem:[%s1324_s5 + $0x20] sm:$0xff] %vm40_vm0, %v679_v24  ;;  %774 = vrsqrt.f32 %v467_v35  ;;  %vm544_vm8 = vmor %vm542_vm7, %vm543_vm6  ;;  %vm552_vm10 = vweird.f32 %v467_v35 }
 0x236   :  { %v535_v60 = vsel %vm534_vm5, %v771_v41, %v531_v23  ;;  %v538_v19 = vmul.f32 %v773_v55, %v537_v58 }
 0x237   :  { %v644_v61 = vmul.f32 %v1187_v9, %v535_v60 }
 0x238   :  { %v539_v38 = vmul.f32 0.5, %v538_v19 }
 0x239   :  { %v660_v25 = vmul.f32 %v644_v61, %v1106_v28 }
 0x23a   :  { %v540_v1 = vsub.f32 1.5, %v539_v38 }
 0x23b   :  { %v775_v11 = vpop.eup %774  ;;  %v680_v2 = vadd.f32 %v1192_v29, %v660_v25 }
 0x23c   :  { %v541_v4 = vmul.f32 %v773_v55, %v540_v1  ;;  %v547_v5 = vmul.f32 %v775_v11, %v467_v35  ;;  %vm553_vm9 = vweird.f32 %v775_v11 }
 0x23d   :  { %696 = vst.msk [vmem:[%s1324_s5 + $0x28] sm:$0xff] %vm40_vm0, %v680_v2  ;;  %vm554_vm11 = vmor %vm552_vm10, %vm553_vm9 }
 0x23e   :  { %v545_v16 = vsel %vm544_vm8, %v773_v55, %v541_v4  ;;  %v548_v14 = vmul.f32 %v775_v11, %v547_v5  ;;  %v421_v59 = vpop.xlane.xlu0 %420 }
 0x23f   :  { %v645_v6 = vmul.f32 %v1187_v9, %v545_v16  ;;  %v451_v28 = vmul.f32 %v421_v59, %v1057_v48 }
 0x240   :  { %v549_v3 = vmul.f32 0.5, %v548_v14 }
 0x241   :  { %v661_v7 = vmul.f32 %v645_v6, %v1113_v32  ;;  %v468_v8 = vadd.f32 1e-05, %v451_v28 }
 0x242   :  { %v550_v49 = vsub.f32 1.5, %v549_v3 }
 0x243   :  { %v681_v15 = vadd.f32 %v1192_v29, %v661_v7  ;;  %776 = vrsqrt.f32 %v468_v8  ;;  %vm562_vm13 = vweird.f32 %v468_v8 }
 0x244   :  { %v551_v10 = vmul.f32 %v775_v11, %v550_v49 }
 0x245   :  { %697 = vst.msk [vmem:[%s1324_s5 + $0x30] sm:$0xff] %vm40_vm0, %v681_v15 }
 0x246   :  { %v555_v30 = vsel %vm554_vm11, %v775_v11, %v551_v10  ;;  %v424_v13 = vpop.xlane.xlu1 %423 }
 0x247   :  { %v646_v17 = vmul.f32 %v1187_v9, %v555_v30  ;;  %v452_v32 = vmul.f32 %v424_v13, %v1057_v48 }
 0x249   :  { %v777_v18 = vpop.eup %776  ;;  %v662_v34 = vmul.f32 %v646_v17, %v1120_v36  ;;  %v469_v63 = vadd.f32 1e-05, %v452_v32 }
 0x24a   :  { %v557_v22 = vmul.f32 %v777_v18, %v468_v8  ;;  %vm563_vm12 = vweird.f32 %v777_v18 }
 0x24b   :  { %v682_v21 = vadd.f32 %v1192_v29, %v662_v34  ;;  %778 = vrsqrt.f32 %v469_v63  ;;  %vm564_vm14 = vmor %vm562_vm13, %vm563_vm12  ;;  %vm572_vm1 = vweird.f32 %v469_v63 }
 0x24c   :  { %v558_v56 = vmul.f32 %v777_v18, %v557_v22 }
 0x24d   :  { %698 = vst.msk [vmem:[%s1324_s5 + $0x38] sm:$0xff] %vm40_vm0, %v682_v21 }
 0x24e   :  { %v559_v37 = vmul.f32 0.5, %v558_v56  ;;  %v427_v27 = vpop.xlane.xlu2 %426 }
 0x24f   :  { %v453_v39 = vmul.f32 %v427_v27, %v1057_v48 }
 0x250   :  { %v560_v41 = vsub.f32 1.5, %v559_v37 }
 0x251   :  { %v779_v42 = vpop.eup %778  ;;  %v470_v43 = vadd.f32 1e-05, %v453_v39 }
 0x252   :  { %v561_v36 = vmul.f32 %v777_v18, %v560_v41  ;;  %v567_v45 = vmul.f32 %v779_v42, %v469_v63  ;;  %vm573_vm15 = vweird.f32 %v779_v42 }
 0x253   :  { %780 = vrsqrt.f32 %v470_v43  ;;  %vm574_vm2 = vmor %vm572_vm1, %vm573_vm15  ;;  %vm582_vm4 = vweird.f32 %v470_v43 }
 0x254   :  { %v565_v46 = vsel %vm564_vm14, %v777_v18, %v561_v36  ;;  %v568_v47 = vmul.f32 %v779_v42, %v567_v45 }
 0x255   :  { %v647_v12 = vmul.f32 %v1187_v9, %v565_v46 }
 0x256   :  { %v569_v31 = vmul.f32 0.5, %v568_v47  ;;  %v430_v50 = vpop.xlane.xlu0 %429 }
 0x257   :  { %v663_v51 = vmul.f32 %v647_v12, %v1127_v40  ;;  %v454_v33 = vmul.f32 %v430_v50, %v1057_v48 }
 0x258   :  { %v570_v52 = vsub.f32 1.5, %v569_v31 }
 0x259   :  { %v781_v54 = vpop.eup %780  ;;  %v683_v55 = vadd.f32 %v1192_v29, %v663_v51  ;;  %v471_v24 = vadd.f32 1e-05, %v454_v33 }
 0x25a   :  { %v571_v35 = vmul.f32 %v779_v42, %v570_v52  ;;  %v577_v23 = vmul.f32 %v781_v54, %v470_v43  ;;  %vm583_vm3 = vweird.f32 %v781_v54 }
 0x25b   :  { %699 = vst.msk [vmem:[%s1324_s5 + $0x40] sm:$0xff] %vm40_vm0, %v683_v55  ;;  %782 = vrsqrt.f32 %v471_v24  ;;  %vm584_vm5 = vmor %vm582_vm4, %vm583_vm3  ;;  %vm592_vm7 = vweird.f32 %v471_v24 }
 0x25c   :  { %v575_v58 = vsel %vm574_vm2, %v779_v42, %v571_v35  ;;  %v578_v40 = vmul.f32 %v781_v54, %v577_v23 }
 0x25d   :  { %v648_v60 = vmul.f32 %v1187_v9, %v575_v58 }
 0x25e   :  { %v579_v19 = vmul.f32 0.5, %v578_v40  ;;  %v433_v61 = vpop.xlane.xlu1 %432 }
 0x25f   :  { %v664_v38 = vmul.f32 %v648_v60, %v1134_v44  ;;  %v455_v25 = vmul.f32 %v433_v61, %v1057_v48 }
 0x260   :  { %v580_v1 = vsub.f32 1.5, %v579_v19 }
 0x261   :  { %v783_v11 = vpop.eup %782  ;;  %v684_v2 = vadd.f32 %v1192_v29, %v664_v38  ;;  %v472_v4 = vadd.f32 1e-05, %v455_v25 }
 0x262   :  { %v581_v5 = vmul.f32 %v781_v54, %v580_v1  ;;  %v587_v16 = vmul.f32 %v783_v11, %v471_v24  ;;  %vm593_vm6 = vweird.f32 %v783_v11 }
 0x263   :  { %700 = vst.msk [vmem:[%s1324_s5 + $0x48] sm:$0xff] %vm40_vm0, %v684_v2  ;;  %784 = vrsqrt.f32 %v472_v4  ;;  %vm594_vm8 = vmor %vm592_vm7, %vm593_vm6  ;;  %vm602_vm10 = vweird.f32 %v472_v4 }
 0x264   :  { %v585_v14 = vsel %vm584_vm5, %v781_v54, %v581_v5  ;;  %v588_v44 = vmul.f32 %v783_v11, %v587_v16 }
 0x265   :  { %v649_v59 = vmul.f32 %v1187_v9, %v585_v14 }
 0x266   :  { %v589_v6 = vmul.f32 0.5, %v588_v44  ;;  %v436_v28 = vpop.xlane.xlu2 %435 }
 0x267   :  { %v665_v3 = vmul.f32 %v649_v59, %v1141_v20  ;;  %v456_v7 = vmul.f32 %v436_v28, %v1057_v48 }
 0x268   :  { %v590_v8 = vsub.f32 1.5, %v589_v6 }
 0x269   :  { %v785_v49 = vpop.eup %784  ;;  %v685_v15 = vadd.f32 %v1192_v29, %v665_v3  ;;  %v473_v10 = vadd.f32 1e-05, %v456_v7 }
 0x26a   :  { %v591_v30 = vmul.f32 %v783_v11, %v590_v8  ;;  %v597_v13 = vmul.f32 %v785_v49, %v472_v4  ;;  %vm603_vm9 = vweird.f32 %v785_v49 }
 0x26b   :  { %701 = vst.msk [vmem:[%s1324_s5 + $0x50] sm:$0xff] %vm40_vm0, %v685_v15  ;;  %786 = vrsqrt.f32 %v473_v10  ;;  %vm604_vm11 = vmor %vm602_vm10, %vm603_vm9  ;;  %vm612_vm13 = vweird.f32 %v473_v10 }
 0x26c   :  { %v595_v17 = vsel %vm594_vm8, %v783_v11, %v591_v30  ;;  %v598_v20 = vmul.f32 %v785_v49, %v597_v13 }
 0x26d   :  { %v650_v32 = vmul.f32 %v1187_v9, %v595_v17 }
 0x26e   :  { %v599_v18 = vmul.f32 0.5, %v598_v20  ;;  %v439_v34 = vpop.xlane.xlu0 %438 }
 0x26f   :  { %v666_v63 = vmul.f32 %v650_v32, %v1148_v53  ;;  %v457_v22 = vmul.f32 %v439_v34, %v1057_v48 }
 0x270   :  { %v600_v21 = vsub.f32 1.5, %v599_v18 }
 0x271   :  { %v787_v56 = vpop.eup %786  ;;  %v686_v37 = vadd.f32 %v1192_v29, %v666_v63  ;;  %v474_v27 = vadd.f32 1e-05, %v457_v22 }
 0x272   :  { %v601_v39 = vmul.f32 %v785_v49, %v600_v21  ;;  %v607_v41 = vmul.f32 %v787_v56, %v473_v10  ;;  %vm613_vm12 = vweird.f32 %v787_v56 }
 0x273   :  { %702 = vst.msk [vmem:[%s1324_s5 + $0x58] sm:$0xff] %vm40_vm0, %v686_v37  ;;  %788 = vrsqrt.f32 %v474_v27  ;;  %vm614_vm14 = vmor %vm612_vm13, %vm613_vm12  ;;  %vm622_vm1 = vweird.f32 %v474_v27 }
 0x274   :  { %v605_v42 = vsel %vm604_vm11, %v785_v49, %v601_v39  ;;  %v608_v53 = vmul.f32 %v787_v56, %v607_v41 }
 0x275   :  { %v651_v43 = vmul.f32 %v1187_v9, %v605_v42 }
 0x276   :  { %v609_v36 = vmul.f32 0.5, %v608_v53  ;;  %v442_v45 = vpop.xlane.xlu1 %441 }
 0x277   :  { %v667_v46 = vmul.f32 %v651_v43, %v1155_v57  ;;  %v458_v47 = vmul.f32 %v442_v45, %v1057_v48 }
 0x278   :  { %v610_v12 = vsub.f32 1.5, %v609_v36 }
 0x279   :  { %v789_v31 = vpop.eup %788  ;;  %v687_v50 = vadd.f32 %v1192_v29, %v667_v46  ;;  %v475_v51 = vadd.f32 1e-05, %v458_v47 }
 0x27a   :  { %v611_v33 = vmul.f32 %v787_v56, %v610_v12  ;;  %v617_v52 = vmul.f32 %v789_v31, %v474_v27  ;;  %vm623_vm15 = vweird.f32 %v789_v31 }
 0x27b   :  { %703 = vst.msk [vmem:[%s1324_s5 + $0x60] sm:$0xff] %vm40_vm0, %v687_v50  ;;  %790 = vrsqrt.f32 %v475_v51  ;;  %vm624_vm2 = vmor %vm622_vm1, %vm623_vm15  ;;  %vm632_vm4 = vweird.f32 %v475_v51 }
 0x27c   :  { %v615_v54 = vsel %vm614_vm14, %v787_v56, %v611_v33  ;;  %v618_v57 = vmul.f32 %v789_v31, %v617_v52 }
 0x27d   :  { %v652_v48 = vmul.f32 %v1187_v9, %v615_v54 }
 0x27e   :  { %v619_v55 = vmul.f32 0.5, %v618_v57 }
 0x27f   :  { %v668_v24 = vmul.f32 %v652_v48, %v1162_v62 }
 0x280   :  { %v620_v35 = vsub.f32 1.5, %v619_v55 }
 0x281   :  { %v791_v23 = vpop.eup %790  ;;  %v688_v58 = vadd.f32 %v1192_v29, %v668_v24 }
 0x282   :  { %v621_v40 = vmul.f32 %v789_v31, %v620_v35  ;;  %v627_v60 = vmul.f32 %v791_v23, %v475_v51  ;;  %vm633_vm3 = vweird.f32 %v791_v23 }
 0x283   :  { %704 = vst.msk [vmem:[%s1324_s5 + $0x68] sm:$0xff] %vm40_vm0, %v688_v58  ;;  %vm634_vm5 = vmor %vm632_vm4, %vm633_vm3 }
 0x284   :  { %v625_v19 = vsel %vm624_vm2, %v789_v31, %v621_v40  ;;  %v628_v61 = vmul.f32 %v791_v23, %v627_v60 }
 0x285   :  { %v653_v38 = vmul.f32 %v1187_v9, %v625_v19 }
 0x286   :  { %v629_v25 = vmul.f32 0.5, %v628_v61 }
 0x287   :  { %v669_v62 = vmul.f32 %v653_v38, %v1169_v0 }
 0x288   :  { %v630_v1 = vsub.f32 1.5, %v629_v25 }
 0x289   :  { %v689_v11 = vadd.f32 %v1192_v29, %v669_v62 }
 0x28a   :  { %v631_v2 = vmul.f32 %v791_v23, %v630_v1 }
 0x28b   :  { %705 = vst.msk [vmem:[%s1324_s5 + $0x70] sm:$0xff] %vm40_vm0, %v689_v11 }
 0x28c   :  { %v635_v4 = vsel %vm634_vm5, %v791_v23, %v631_v2 }
 0x28d   :  { %v654_v5 = vmul.f32 %v1187_v9, %v635_v4 }
 0x28f   :  { %v670_v16 = vmul.f32 %v654_v5, %v1177_v26 }
 0x291   :  { %v690_v14 = vadd.f32 %v1192_v29, %v670_v16 }
 0x293   :  { %706 = vst.msk [vmem:[%s1324_s5 + $0x78] sm:$0xff] %vm40_vm0, %v690_v14 }

</bundles_post_ra>
